<compile_context>
chip_gen: v7x
topology: tpu7x:2x2x1
jax: 0.10.0
libtpu: 0.0.40
codegen_flags: <defaults>
</compile_context>

<pallas_src>
import jax
import jax.numpy as jnp
import numpy as np
from jax.experimental import pallas as pl
from jax.experimental.pallas import tpu as pltpu

_VPU_MAX_C = 8                         # <= this many channels: skip the MXU
_LANE = 128
_VPU_LANE_CHUNK = 1024                 # strip-mine width for the VPU path
_MIN_BLOCK_BYTES = 2 * 1024 * 1024     # per-input-block byte target (review)
_MAX_BLOCK_BYTES = 8 * 1024 * 1024
_MEGACORE_MIN_BYTES = 2 * 1024 * 1024  # below this, don't force grid splits
_DEFAULT_VMEM_CAP = 64 * 1024 * 1024   # v7x lower bound; safe everywhere


def _round_up(v, m):
    return -(-v // m) * m


def _padded_channels(C, itemsize):
    """Sublane-padded channel count (8 for f32, 16 for bf16, 32 for 8-bit)."""
    sub = {4: 8, 2: 16, 1: 32}.get(itemsize, 8)
    return max(sub, _round_up(C, sub))


def _vmem_capacity_bytes():
    try:
        return int(pltpu.get_tpu_info().vmem_capacity_bytes)
    except Exception:
        return _DEFAULT_VMEM_CAP


def _pick_tiles(N, C, S, itemsize, target_bytes):
    """Pick (batch_tile, spatial_tile) so one padded input block ~target_bytes."""
    c_pad = _padded_channels(C, itemsize)
    col_bytes = c_pad * itemsize                       # one lane, all channels
    per_image = col_bytes * _round_up(S, _LANE)        # padded bytes per image

    if per_image >= target_bytes:
        # Tile the spatial axis of a single image (lane-dense, 128-multiple).
        nb = 1
        ts = max(_LANE, (target_bytes // col_bytes) // _LANE * _LANE)
        ts = min(ts, S)
    else:
        # Whole images fit: block over the batch axis as well.
        ts = S
        nb = int(max(1, min(N, target_bytes // per_image)))

    # Megacore / 2-TC (v7x): keep >= 2 grid steps when the problem is big
    # enough that splitting is worth the per-step overhead.
    if (pl.cdiv(N, nb) * pl.cdiv(S, ts) < 2
            and N * per_image >= _MEGACORE_MIN_BYTES):
        if N >= 2:
            nb = pl.cdiv(N, 2)
        elif S >= 2 * _LANE:
            ts = _round_up(pl.cdiv(S, 2), _LANE)
    return nb, ts


# ----------------------------------------------------------------------------
# Kernels: out[b, :, s] = W @ x[b, :, s] on a (Nb, C, TS) block
# ----------------------------------------------------------------------------
def _channel_mix_vpu_kernel(w_ref, x_ref, o_ref):
    """Small-C path: SMEM weight scalars * x rows, strip-mined over lanes.

    Avoids the MXU's padding waste for C<=8 and keeps temporaries chunk-sized
    (in vregs) rather than whole-tile VMEM intermediates.
    """
    Nb, C, TS = x_ref.shape
    chunk = min(TS, _VPU_LANE_CHUNK)
    n_full = TS // chunk
    rem = TS - n_full * chunk

    # Hoist the C*C scalar weight reads (SMEM -> sreg) out of all loops.
    w = [[w_ref[o, c] for c in range(C)] for o in range(C)]

    def mix(b, start, size):
        x_chunk = x_ref[b, :, pl.ds(start, size)].astype(jnp.float32)  # (C, size)
        rows = []
        for o in range(C):
            acc = w[o][0] * x_chunk[0:1, :]
            for c in range(1, C):
                acc = acc + w[o][c] * x_chunk[c:c + 1, :]
            rows.append(acc)
        out = rows[0] if C == 1 else jnp.concatenate(rows, axis=0)     # (C, size)
        o_ref[b, :, pl.ds(start, size)] = out.astype(o_ref.dtype)

    def batch_body(b, carry):
        def chunk_body(i, c2):
            start = pl.multiple_of(i * chunk, _LANE)
            mix(b, start, chunk)
            return c2
        jax.lax.fori_loop(0, n_full, chunk_body, 0, unroll=(n_full <= 8))
        if rem > 0:                      # static-size ragged tail of the block
            mix(b, n_full * chunk, rem)
        return carry

    jax.lax.fori_loop(0, Nb, batch_body, 0, unroll=(Nb <= 4))


def _channel_mix_mxu_kernel(w_ref, x_ref, o_ref):
    """Large-C path: resident f32 weight, HIGHEST-precision MXU matmul."""
    Nb = x_ref.shape[0]
    w = w_ref[...]                                     # (C, C) f32, resident

    def body(b, carry):
        res = jnp.dot(w, x_ref[b].astype(jnp.float32),
                      precision=jax.lax.Precision.HIGHEST,
                      preferred_element_type=jnp.float32)
        o_ref[b] = res.astype(o_ref.dtype)
        return carry

    jax.lax.fori_loop(0, Nb, body, 0, unroll=(Nb <= 4))


# ----------------------------------------------------------------------------
# pallas_call wrapper
# ----------------------------------------------------------------------------
def channel_mix_nchw(x, w, *, spatial_tile=None, batch_tile=None):
    """out[n, o, s] = sum_c w[o, c] * x[n, c, s].

    x: (N, C, S), w: (C, C). Returns (N, C, S) with x.dtype. The weight is
    kept in float32 (never downcast to the activation dtype).
    """
    N, C, S = x.shape
    assert w.shape == (C, C)
    w = w.astype(jnp.float32)
    itemsize = x.dtype.itemsize

    vmem_cap = _vmem_capacity_bytes()
    # Budget ~60% of VMEM across: 2x double-buffered (in + out) blocks plus
    # in-kernel f32 temporaries (~6x one input block, conservatively).
    budget = int(vmem_cap * 0.60)
    target = max(_MIN_BLOCK_BYTES, min(_MAX_BLOCK_BYTES, budget // 6))

    nb, ts = _pick_tiles(N, C, S, itemsize, target)
    if batch_tile is not None:
        nb = int(max(1, min(batch_tile, N)))
    if spatial_tile is not None:
        ts = int(max(1, min(spatial_tile, S)))

    grid = (pl.cdiv(N, nb), pl.cdiv(S, ts))            # ragged tails OK

    if C <= _VPU_MAX_C:
        kernel = _channel_mix_vpu_kernel
        w_spec = pl.BlockSpec(memory_space=pltpu.MemorySpace.SMEM)
    else:
        kernel = _channel_mix_mxu_kernel
        w_spec = pl.BlockSpec((C, C), lambda n, s: (0, 0))   # resident weight

    cost = pl.CostEstimate(
        flops=2 * N * S * C * C,
        transcendentals=0,
        bytes_accessed=2 * N * C * S * itemsize + C * C * 4,
    )

    return pl.pallas_call(
        kernel,
        out_shape=jax.ShapeDtypeStruct((N, C, S), x.dtype),
        grid_spec=pltpu.PrefetchScalarGridSpec(
            num_scalar_prefetch=0,
            grid=grid,
            in_specs=[
                w_spec,
                pl.BlockSpec((nb, C, ts), lambda n, s: (n, 0, s)),
            ],
            out_specs=pl.BlockSpec((nb, C, ts), lambda n, s: (n, 0, s)),
        ),
        compiler_params=pltpu.CompilerParams(
            dimension_semantics=("parallel", "parallel"),
            vmem_limit_bytes=int(vmem_cap * 0.75),
        ),
        cost_estimate=cost,
    )(w, x)


# ----------------------------------------------------------------------------
# Module wrapper (parameter construction + glue in plain JAX/numpy)
# ----------------------------------------------------------------------------
def sample_Q(num_channels, n_sample=10, seed=0):
    """Deterministic re-implementation of RandomRotation.sample_Q."""
    key = jax.random.PRNGKey(seed)
    Qs, errs = [], []
    for _ in range(n_sample):
        key, sub = jax.random.split(key)
        A = jax.random.uniform(sub, (num_channels, num_channels), jnp.float32)
        Q, _ = jnp.linalg.qr(A)
        err = jnp.max(jnp.abs(jnp.linalg.inv(jnp.linalg.inv(Q)) - Q))
        Qs.append(Q)
        errs.append(float(err))
    idx_best = int(np.argmin(errs))
    Q = Qs[idx_best]
    QInv = jnp.linalg.inv(Q)
    return Q, QInv


class RandomRotationPallas:
    def __init__(self, num_channels, seed=0):
        Q, QInv = sample_Q(num_channels, n_sample=10, seed=seed)
        # Stored as [C, C, 1, 1] like the PyTorch buffers.
        self.Q = Q.reshape(num_channels, num_channels, 1, 1)
        self.QInv = QInv.reshape(num_channels, num_channels, 1, 1)
        self.num_channels = num_channels

    def __call__(self, x, logdet, reverse=False):
        # x: NCHW
        W = self.Q if reverse else self.QInv
        N, C, H, Wsp = x.shape
        w_mat = W.reshape(C, C)
        # NCHW -> (N, C, S): merging trailing H, W is a free reshape.
        x3 = x.reshape(N, C, H * Wsp)
        out3 = channel_mix_nchw(x3, w_mat)
        out = out3.reshape(N, C, H, Wsp)
        # Q orthogonal => |det| == 1 => zero log-det contribution.
        return out, logdet


if __name__ == "__main__":
    # ---- Primary test: module semantics at the spec's small shape ----------
    N, C, H, W = 2, 4, 16, 16
    key = jax.random.PRNGKey(0)
    x = jax.random.normal(key, (N, C, H, W), dtype=jnp.float32)
    logdet = jnp.zeros((N,), dtype=jnp.float32)

    module = RandomRotationPallas(C, seed=0)

    out_fwd, logdet_out = module(x, logdet, reverse=False)   # conv with QInv
    out_fwd = jax.block_until_ready(out_fwd)
    out_rev, _ = module(x, logdet, reverse=True)              # conv with Q
    out_rev = jax.block_until_ready(out_rev)

    QInv_np = np.asarray(module.QInv, np.float64).reshape(C, C)
    Q_np = np.asarray(module.Q, np.float64).reshape(C, C)
    x_np = np.asarray(x, np.float64)
    ref_fwd = np.einsum("oc,nchw->nohw", QInv_np, x_np).astype(np.float32)
    ref_rev = np.einsum("oc,nchw->nohw", Q_np, x_np).astype(np.float32)

    assert out_fwd.shape == x.shape and out_fwd.dtype == x.dtype
    np.testing.assert_allclose(np.asarray(out_fwd), ref_fwd,
                               rtol=1e-5, atol=1e-5)
    np.testing.assert_allclose(np.asarray(out_rev), ref_rev,
                               rtol=1e-5, atol=1e-5)
    roundtrip, _ = module(out_fwd, logdet, reverse=True)
    np.testing.assert_allclose(np.asarray(roundtrip), np.asarray(x),
                               rtol=1e-4, atol=1e-4)
    assert jnp.array_equal(logdet_out, logdet)

    # ---- Secondary test: MXU path (large C) + ragged spatial tail ----------
    N2, C2, S2 = 1, 128, 200                     # S=200: ragged with 128-tiles
    kx, kw = jax.random.split(jax.random.PRNGKey(1))
    x2 = jax.random.normal(kx, (N2, C2, S2), dtype=jnp.float32)
    w2 = jax.random.normal(kw, (C2, C2), dtype=jnp.float32)
    out2 = jax.block_until_ready(channel_mix_nchw(x2, w2, spatial_tile=128))
    ref2 = np.einsum("oc,ncs->nos", np.asarray(w2, np.float64),
                     np.asarray(x2, np.float64)).astype(np.float32)
    # precision=HIGHEST on the MXU -> near-f32-exact results.
    np.testing.assert_allclose(np.asarray(out2), ref2, rtol=1e-5, atol=1e-4)

    # ---- Tertiary test: VPU path, multi-chunk strip-mining + ragged batch --
    N3, C3, S3 = 3, 4, 40 * 64                   # S=2560 (20 * 128)
    kx3, kw3 = jax.random.split(jax.random.PRNGKey(2))
    x3 = jax.random.normal(kx3, (N3, C3, S3), dtype=jnp.float32)
    w3 = jax.random.normal(kw3, (C3, C3), dtype=jnp.float32)
    out3 = jax.block_until_ready(
        channel_mix_nchw(x3, w3, batch_tile=2, spatial_tile=1024))
    ref3 = np.einsum("oc,ncs->nos", np.asarray(w3, np.float64),
                     np.asarray(x3, np.float64)).astype(np.float32)
    np.testing.assert_allclose(np.asarray(out3), ref3, rtol=1e-5, atol=1e-5)

    print("KERNEL_OK")
</pallas_src>

<mosaic_0001>
module attributes {stable_mosaic.version = 11 : i64} {
  func.func @_channel_mix_vpu_kernel(%arg0: i32, %arg1: i32, %arg2: memref<4x4xf32, #tpu.memory_space<smem>>, %arg3: memref<2x4x256xf32, #tpu.memory_space<vmem>>, %arg4: memref<2x4x256xf32, #tpu.memory_space<vmem>>) attributes {dimension_semantics = [#tpu.dimension_semantics<parallel>, #tpu.dimension_semantics<parallel>], iteration_bounds = array<i64: 1, 1>, scalar_prefetch = 0 : i64, scratch_operands = 0 : i64, tpu.core_type = #tpu.core_type<tc>, window_params = [{transform_indices = @transform_0, window_bounds = array<i64: 4, 4>}, {transform_indices = @transform_1, window_bounds = array<i64: 2, 4, 256>}, {transform_indices = @transform_2, window_bounds = array<i64: 2, 4, 256>}]} {
    %c0 = arith.constant 0 : index
    %c0_0 = arith.constant 0 : index
    %0 = memref.load %arg2[%c0, %c0_0] : memref<4x4xf32, #tpu.memory_space<smem>>
    %c0_1 = arith.constant 0 : index
    %c1 = arith.constant 1 : index
    %1 = memref.load %arg2[%c0_1, %c1] : memref<4x4xf32, #tpu.memory_space<smem>>
    %c0_2 = arith.constant 0 : index
    %c2 = arith.constant 2 : index
    %2 = memref.load %arg2[%c0_2, %c2] : memref<4x4xf32, #tpu.memory_space<smem>>
    %c0_3 = arith.constant 0 : index
    %c3 = arith.constant 3 : index
    %3 = memref.load %arg2[%c0_3, %c3] : memref<4x4xf32, #tpu.memory_space<smem>>
    %c1_4 = arith.constant 1 : index
    %c0_5 = arith.constant 0 : index
    %4 = memref.load %arg2[%c1_4, %c0_5] : memref<4x4xf32, #tpu.memory_space<smem>>
    %c1_6 = arith.constant 1 : index
    %c1_7 = arith.constant 1 : index
    %5 = memref.load %arg2[%c1_6, %c1_7] : memref<4x4xf32, #tpu.memory_space<smem>>
    %c1_8 = arith.constant 1 : index
    %c2_9 = arith.constant 2 : index
    %6 = memref.load %arg2[%c1_8, %c2_9] : memref<4x4xf32, #tpu.memory_space<smem>>
    %c1_10 = arith.constant 1 : index
    %c3_11 = arith.constant 3 : index
    %7 = memref.load %arg2[%c1_10, %c3_11] : memref<4x4xf32, #tpu.memory_space<smem>>
    %c2_12 = arith.constant 2 : index
    %c0_13 = arith.constant 0 : index
    %8 = memref.load %arg2[%c2_12, %c0_13] : memref<4x4xf32, #tpu.memory_space<smem>>
    %c2_14 = arith.constant 2 : index
    %c1_15 = arith.constant 1 : index
    %9 = memref.load %arg2[%c2_14, %c1_15] : memref<4x4xf32, #tpu.memory_space<smem>>
    %c2_16 = arith.constant 2 : index
    %c2_17 = arith.constant 2 : index
    %10 = memref.load %arg2[%c2_16, %c2_17] : memref<4x4xf32, #tpu.memory_space<smem>>
    %c2_18 = arith.constant 2 : index
    %c3_19 = arith.constant 3 : index
    %11 = memref.load %arg2[%c2_18, %c3_19] : memref<4x4xf32, #tpu.memory_space<smem>>
    %c3_20 = arith.constant 3 : index
    %c0_21 = arith.constant 0 : index
    %12 = memref.load %arg2[%c3_20, %c0_21] : memref<4x4xf32, #tpu.memory_space<smem>>
    %c3_22 = arith.constant 3 : index
    %c1_23 = arith.constant 1 : index
    %13 = memref.load %arg2[%c3_22, %c1_23] : memref<4x4xf32, #tpu.memory_space<smem>>
    %c3_24 = arith.constant 3 : index
    %c2_25 = arith.constant 2 : index
    %14 = memref.load %arg2[%c3_24, %c2_25] : memref<4x4xf32, #tpu.memory_space<smem>>
    %c3_26 = arith.constant 3 : index
    %c3_27 = arith.constant 3 : index
    %15 = memref.load %arg2[%c3_26, %c3_27] : memref<4x4xf32, #tpu.memory_space<smem>>
    %c0_i32 = arith.constant 0 : i32
    %c0_i32_28 = arith.constant 0 : i32
    %c256_i32 = arith.constant 256 : i32
    %16 = arith.muli %c0_i32_28, %c256_i32 : i32
    %17 = tpu.assume_multiple %16, 128 : i32
    %18 = arith.index_cast %c0_i32 : i32 to index
    %c0_29 = arith.constant 0 : index
    %19 = arith.index_cast %17 : i32 to index
    %20 = vector.load %arg3[%18, %c0_29, %19] : memref<2x4x256xf32, #tpu.memory_space<vmem>>, vector<1x4x256xf32>
    %21 = vector.shape_cast %20 : vector<1x4x256xf32> to vector<4x256xf32>
    %22 = vector.extract_strided_slice %21 {offsets = [0, 0], sizes = [1, 256], strides = [1, 1]} : vector<4x256xf32> to vector<1x256xf32>
    %23 = vector.broadcast %0 : f32 to vector<1x256xf32>
    %24 = arith.mulf %23, %22 : vector<1x256xf32>
    %25 = vector.extract_strided_slice %21 {offsets = [1, 0], sizes = [1, 256], strides = [1, 1]} : vector<4x256xf32> to vector<1x256xf32>
    %26 = vector.broadcast %1 : f32 to vector<1x256xf32>
    %27 = arith.mulf %26, %25 : vector<1x256xf32>
    %28 = arith.addf %24, %27 : vector<1x256xf32>
    %29 = vector.extract_strided_slice %21 {offsets = [2, 0], sizes = [1, 256], strides = [1, 1]} : vector<4x256xf32> to vector<1x256xf32>
    %30 = vector.broadcast %2 : f32 to vector<1x256xf32>
    %31 = arith.mulf %30, %29 : vector<1x256xf32>
    %32 = arith.addf %28, %31 : vector<1x256xf32>
    %33 = vector.extract_strided_slice %21 {offsets = [3, 0], sizes = [1, 256], strides = [1, 1]} : vector<4x256xf32> to vector<1x256xf32>
    %34 = vector.broadcast %3 : f32 to vector<1x256xf32>
    %35 = arith.mulf %34, %33 : vector<1x256xf32>
    %36 = arith.addf %32, %35 : vector<1x256xf32>
    %37 = vector.extract_strided_slice %21 {offsets = [0, 0], sizes = [1, 256], strides = [1, 1]} : vector<4x256xf32> to vector<1x256xf32>
    %38 = vector.broadcast %4 : f32 to vector<1x256xf32>
    %39 = arith.mulf %38, %37 : vector<1x256xf32>
    %40 = vector.extract_strided_slice %21 {offsets = [1, 0], sizes = [1, 256], strides = [1, 1]} : vector<4x256xf32> to vector<1x256xf32>
    %41 = vector.broadcast %5 : f32 to vector<1x256xf32>
    %42 = arith.mulf %41, %40 : vector<1x256xf32>
    %43 = arith.addf %39, %42 : vector<1x256xf32>
    %44 = vector.extract_strided_slice %21 {offsets = [2, 0], sizes = [1, 256], strides = [1, 1]} : vector<4x256xf32> to vector<1x256xf32>
    %45 = vector.broadcast %6 : f32 to vector<1x256xf32>
    %46 = arith.mulf %45, %44 : vector<1x256xf32>
    %47 = arith.addf %43, %46 : vector<1x256xf32>
    %48 = vector.extract_strided_slice %21 {offsets = [3, 0], sizes = [1, 256], strides = [1, 1]} : vector<4x256xf32> to vector<1x256xf32>
    %49 = vector.broadcast %7 : f32 to vector<1x256xf32>
    %50 = arith.mulf %49, %48 : vector<1x256xf32>
    %51 = arith.addf %47, %50 : vector<1x256xf32>
    %52 = vector.extract_strided_slice %21 {offsets = [0, 0], sizes = [1, 256], strides = [1, 1]} : vector<4x256xf32> to vector<1x256xf32>
    %53 = vector.broadcast %8 : f32 to vector<1x256xf32>
    %54 = arith.mulf %53, %52 : vector<1x256xf32>
    %55 = vector.extract_strided_slice %21 {offsets = [1, 0], sizes = [1, 256], strides = [1, 1]} : vector<4x256xf32> to vector<1x256xf32>
    %56 = vector.broadcast %9 : f32 to vector<1x256xf32>
    %57 = arith.mulf %56, %55 : vector<1x256xf32>
    %58 = arith.addf %54, %57 : vector<1x256xf32>
    %59 = vector.extract_strided_slice %21 {offsets = [2, 0], sizes = [1, 256], strides = [1, 1]} : vector<4x256xf32> to vector<1x256xf32>
    %60 = vector.broadcast %10 : f32 to vector<1x256xf32>
    %61 = arith.mulf %60, %59 : vector<1x256xf32>
    %62 = arith.addf %58, %61 : vector<1x256xf32>
    %63 = vector.extract_strided_slice %21 {offsets = [3, 0], sizes = [1, 256], strides = [1, 1]} : vector<4x256xf32> to vector<1x256xf32>
    %64 = vector.broadcast %11 : f32 to vector<1x256xf32>
    %65 = arith.mulf %64, %63 : vector<1x256xf32>
    %66 = arith.addf %62, %65 : vector<1x256xf32>
    %67 = vector.extract_strided_slice %21 {offsets = [0, 0], sizes = [1, 256], strides = [1, 1]} : vector<4x256xf32> to vector<1x256xf32>
    %68 = vector.broadcast %12 : f32 to vector<1x256xf32>
    %69 = arith.mulf %68, %67 : vector<1x256xf32>
    %70 = vector.extract_strided_slice %21 {offsets = [1, 0], sizes = [1, 256], strides = [1, 1]} : vector<4x256xf32> to vector<1x256xf32>
    %71 = vector.broadcast %13 : f32 to vector<1x256xf32>
    %72 = arith.mulf %71, %70 : vector<1x256xf32>
    %73 = arith.addf %69, %72 : vector<1x256xf32>
    %74 = vector.extract_strided_slice %21 {offsets = [2, 0], sizes = [1, 256], strides = [1, 1]} : vector<4x256xf32> to vector<1x256xf32>
    %75 = vector.broadcast %14 : f32 to vector<1x256xf32>
    %76 = arith.mulf %75, %74 : vector<1x256xf32>
    %77 = arith.addf %73, %76 : vector<1x256xf32>
    %78 = vector.extract_strided_slice %21 {offsets = [3, 0], sizes = [1, 256], strides = [1, 1]} : vector<4x256xf32> to vector<1x256xf32>
    %79 = vector.broadcast %15 : f32 to vector<1x256xf32>
    %80 = arith.mulf %79, %78 : vector<1x256xf32>
    %81 = arith.addf %77, %80 : vector<1x256xf32>
    %82 = tpu.concatenate %36, %51, %66, %81 in 0 : vector<1x256xf32>, vector<1x256xf32>, vector<1x256xf32>, vector<1x256xf32> -> vector<4x256xf32>
    %83 = arith.index_cast %c0_i32 : i32 to index
    %c0_30 = arith.constant 0 : index
    %84 = arith.index_cast %17 : i32 to index
    %85 = vector.load %arg4[%83, %c0_30, %84] : memref<2x4x256xf32, #tpu.memory_space<vmem>>, vector<1x4x256xf32>
    %86 = vector.shape_cast %85 : vector<1x4x256xf32> to vector<4x256xf32>
    %87 = vector.shape_cast %82 : vector<4x256xf32> to vector<1x4x256xf32>
    tpu.vector_store %arg4[%83, %c0_30, %84], %87 {strides = array<i32>} : memref<2x4x256xf32, #tpu.memory_space<vmem>>, vector<1x4x256xf32>,
    %c1_i32 = arith.constant 1 : i32
    %c1_i32_31 = arith.constant 1 : i32
    %c0_i32_32 = arith.constant 0 : i32
    %c256_i32_33 = arith.constant 256 : i32
    %88 = arith.muli %c0_i32_32, %c256_i32_33 : i32
    %89 = tpu.assume_multiple %88, 128 : i32
    %90 = arith.index_cast %c1_i32_31 : i32 to index
    %c0_34 = arith.constant 0 : index
    %91 = arith.index_cast %89 : i32 to index
    %92 = vector.load %arg3[%90, %c0_34, %91] : memref<2x4x256xf32, #tpu.memory_space<vmem>>, vector<1x4x256xf32>
    %93 = vector.shape_cast %92 : vector<1x4x256xf32> to vector<4x256xf32>
    %94 = vector.extract_strided_slice %93 {offsets = [0, 0], sizes = [1, 256], strides = [1, 1]} : vector<4x256xf32> to vector<1x256xf32>
    %95 = vector.broadcast %0 : f32 to vector<1x256xf32>
    %96 = arith.mulf %95, %94 : vector<1x256xf32>
    %97 = vector.extract_strided_slice %93 {offsets = [1, 0], sizes = [1, 256], strides = [1, 1]} : vector<4x256xf32> to vector<1x256xf32>
    %98 = vector.broadcast %1 : f32 to vector<1x256xf32>
    %99 = arith.mulf %98, %97 : vector<1x256xf32>
    %100 = arith.addf %96, %99 : vector<1x256xf32>
    %101 = vector.extract_strided_slice %93 {offsets = [2, 0], sizes = [1, 256], strides = [1, 1]} : vector<4x256xf32> to vector<1x256xf32>
    %102 = vector.broadcast %2 : f32 to vector<1x256xf32>
    %103 = arith.mulf %102, %101 : vector<1x256xf32>
    %104 = arith.addf %100, %103 : vector<1x256xf32>
    %105 = vector.extract_strided_slice %93 {offsets = [3, 0], sizes = [1, 256], strides = [1, 1]} : vector<4x256xf32> to vector<1x256xf32>
    %106 = vector.broadcast %3 : f32 to vector<1x256xf32>
    %107 = arith.mulf %106, %105 : vector<1x256xf32>
    %108 = arith.addf %104, %107 : vector<1x256xf32>
    %109 = vector.extract_strided_slice %93 {offsets = [0, 0], sizes = [1, 256], strides = [1, 1]} : vector<4x256xf32> to vector<1x256xf32>
    %110 = vector.broadcast %4 : f32 to vector<1x256xf32>
    %111 = arith.mulf %110, %109 : vector<1x256xf32>
    %112 = vector.extract_strided_slice %93 {offsets = [1, 0], sizes = [1, 256], strides = [1, 1]} : vector<4x256xf32> to vector<1x256xf32>
    %113 = vector.broadcast %5 : f32 to vector<1x256xf32>
    %114 = arith.mulf %113, %112 : vector<1x256xf32>
    %115 = arith.addf %111, %114 : vector<1x256xf32>
    %116 = vector.extract_strided_slice %93 {offsets = [2, 0], sizes = [1, 256], strides = [1, 1]} : vector<4x256xf32> to vector<1x256xf32>
    %117 = vector.broadcast %6 : f32 to vector<1x256xf32>
    %118 = arith.mulf %117, %116 : vector<1x256xf32>
    %119 = arith.addf %115, %118 : vector<1x256xf32>
    %120 = vector.extract_strided_slice %93 {offsets = [3, 0], sizes = [1, 256], strides = [1, 1]} : vector<4x256xf32> to vector<1x256xf32>
    %121 = vector.broadcast %7 : f32 to vector<1x256xf32>
    %122 = arith.mulf %121, %120 : vector<1x256xf32>
    %123 = arith.addf %119, %122 : vector<1x256xf32>
    %124 = vector.extract_strided_slice %93 {offsets = [0, 0], sizes = [1, 256], strides = [1, 1]} : vector<4x256xf32> to vector<1x256xf32>
    %125 = vector.broadcast %8 : f32 to vector<1x256xf32>
    %126 = arith.mulf %125, %124 : vector<1x256xf32>
    %127 = vector.extract_strided_slice %93 {offsets = [1, 0], sizes = [1, 256], strides = [1, 1]} : vector<4x256xf32> to vector<1x256xf32>
    %128 = vector.broadcast %9 : f32 to vector<1x256xf32>
    %129 = arith.mulf %128, %127 : vector<1x256xf32>
    %130 = arith.addf %126, %129 : vector<1x256xf32>
    %131 = vector.extract_strided_slice %93 {offsets = [2, 0], sizes = [1, 256], strides = [1, 1]} : vector<4x256xf32> to vector<1x256xf32>
    %132 = vector.broadcast %10 : f32 to vector<1x256xf32>
    %133 = arith.mulf %132, %131 : vector<1x256xf32>
    %134 = arith.addf %130, %133 : vector<1x256xf32>
    %135 = vector.extract_strided_slice %93 {offsets = [3, 0], sizes = [1, 256], strides = [1, 1]} : vector<4x256xf32> to vector<1x256xf32>
    %136 = vector.broadcast %11 : f32 to vector<1x256xf32>
    %137 = arith.mulf %136, %135 : vector<1x256xf32>
    %138 = arith.addf %134, %137 : vector<1x256xf32>
    %139 = vector.extract_strided_slice %93 {offsets = [0, 0], sizes = [1, 256], strides = [1, 1]} : vector<4x256xf32> to vector<1x256xf32>
    %140 = vector.broadcast %12 : f32 to vector<1x256xf32>
    %141 = arith.mulf %140, %139 : vector<1x256xf32>
    %142 = vector.extract_strided_slice %93 {offsets = [1, 0], sizes = [1, 256], strides = [1, 1]} : vector<4x256xf32> to vector<1x256xf32>
    %143 = vector.broadcast %13 : f32 to vector<1x256xf32>
    %144 = arith.mulf %143, %142 : vector<1x256xf32>
    %145 = arith.addf %141, %144 : vector<1x256xf32>
    %146 = vector.extract_strided_slice %93 {offsets = [2, 0], sizes = [1, 256], strides = [1, 1]} : vector<4x256xf32> to vector<1x256xf32>
    %147 = vector.broadcast %14 : f32 to vector<1x256xf32>
    %148 = arith.mulf %147, %146 : vector<1x256xf32>
    %149 = arith.addf %145, %148 : vector<1x256xf32>
    %150 = vector.extract_strided_slice %93 {offsets = [3, 0], sizes = [1, 256], strides = [1, 1]} : vector<4x256xf32> to vector<1x256xf32>
    %151 = vector.broadcast %15 : f32 to vector<1x256xf32>
    %152 = arith.mulf %151, %150 : vector<1x256xf32>
    %153 = arith.addf %149, %152 : vector<1x256xf32>
    %154 = tpu.concatenate %108, %123, %138, %153 in 0 : vector<1x256xf32>, vector<1x256xf32>, vector<1x256xf32>, vector<1x256xf32> -> vector<4x256xf32>
    %155 = arith.index_cast %c1_i32_31 : i32 to index
    %c0_35 = arith.constant 0 : index
    %156 = arith.index_cast %89 : i32 to index
    %157 = vector.load %arg4[%155, %c0_35, %156] : memref<2x4x256xf32, #tpu.memory_space<vmem>>, vector<1x4x256xf32>
    %158 = vector.shape_cast %157 : vector<1x4x256xf32> to vector<4x256xf32>
    %159 = vector.shape_cast %154 : vector<4x256xf32> to vector<1x4x256xf32>
    tpu.vector_store %arg4[%155, %c0_35, %156], %159 {strides = array<i32>} : memref<2x4x256xf32, #tpu.memory_space<vmem>>, vector<1x4x256xf32>,
    %c1_i32_36 = arith.constant 1 : i32
    %c2_i32 = arith.constant 2 : i32
    return
  }
  func.func @transform_0(%arg0: i32, %arg1: i32) -> (i32, i32) {
    %c0_i32 = arith.constant 0 : i32
    %c0_i32_0 = arith.constant 0 : i32
    %c0_i32_1 = arith.constant 0 : i32
    return %c0_i32, %c0_i32_0 : i32, i32
  }
  func.func @transform_1(%arg0: i32, %arg1: i32) -> (i32, i32, i32) {
    %c0_i32 = arith.constant 0 : i32
    %c0_i32_0 = arith.constant 0 : i32
    return %arg0, %c0_i32, %arg1 : i32, i32, i32
  }
  func.func @transform_2(%arg0: i32, %arg1: i32) -> (i32, i32, i32) {
    %c0_i32 = arith.constant 0 : i32
    %c0_i32_0 = arith.constant 0 : i32
    return %arg0, %c0_i32, %arg1 : i32, i32, i32
  }
}

</mosaic_0001>

<bundles_post_ra>
// kernel: tpu_custom_call.1
= control target key start
LH: loop header
LB: loop body
LE: loop exit
PB: predicated region body
PF: predicated region fallthrough
CT: control target
= control target key end

     0   :  { %7 = vsyncpa [#allocation5], 0  ;;  %s681_s0 = inlined_call_operand.hbm [shape: f32[4,4], index: 0, kind: input, shape index: {}]   ;;  %s682_s1 = inlined_call_operand.hbm [shape: f32[2,4,256], index: 1, kind: input, shape index: {}]   ;;  %s683_s2 = inlined_call_operand.hbm [shape: f32[2,4,256], index: 2, kind: output, shape index: {}]  }
   0x1   :  { %8 = vsyncpa [#allocation3], 0 }
   0x2   :  { %9 = vsyncpa [#allocation4], 0  ;;  %s405_s11 = scalar_lea.hbm %s681_s0, 64 }
   0x3   :  { %p406_p0 = scmp.ne.s32.totalorder %s681_s0, %s405_s11  ;;  %p409_p1 = scmp.lt.u32.totalorder %s405_s11, %s681_s0 }
   0x5   :  { %p411_p2 = pnand %p409_p1, %p406_p0 }
   0x7   :  { %414 = shalt.err (!%p411_p2)
}
   0x8   :  { %s465_s16 = smov [#allocation2]   ;;  %s466_s19 = smov [#allocation6]  }
   0x9   :  { %17 = dma.hbm_to_smem %s681_s0, 64, %s465_s16, [#allocation5]  }
   0xa   :  { %s23_s20 = sshll.u32 %s466_s19, 4  ;;  %s415_s23 = scalar_lea.hbm %s682_s1, 256  ;;  %s24_s20 = int_to_ptr.vmem [resolvable:$true] %s23_s20 }
   0xb   :  { %p416_p3 = scmp.ne.s32.totalorder %s682_s1, %s415_s23  ;;  %p419_p4 = scmp.lt.u32.totalorder %s415_s23, %s682_s1 }
   0xd   :  { %p421_p5 = pnand %p419_p4, %p416_p3 }
   0xf   :  { %424 = shalt.err (!%p421_p5)
}
  0x10   :  { %s425_s28 = scalar_lea.vmem %s24_s20, 256  ;;  %p430_p7 = scmp.lt.s32.totalorder %s24_s20, %s24_s20 }
  0x11   :  { %p426_p6 = scmp.ne.s32.totalorder %s24_s20, %s425_s28  ;;  %p431_p8 = scmp.lt.s32.totalorder %s425_s28, %s425_s28 }
  0x13   :  { %p432_p9 = por %p431_p8, %p430_p7 }
  0x15   :  { %p433_p10 = pnand %p432_p9, %p426_p6 }
  0x17   :  { %436 = shalt.err (!%p433_p10)
}
  0x18   :  { %s467_s0 = smov 128   ;;  %s468_s29 = smov 8  }
  0x19   :  { %29 = dma.hbm_to_vmem [thread:$0]  %s682_s1, 256, %s24_s20, [#allocation3], %s467_s0, %s467_s0, %s468_s29  }
  0x1a   :  { %459 = dma.done.wait [#allocation5], 64  }
  0x1b   :  { %460 = vsyncadd [#allocation5], 4294967232 }
  0x1c   :  { %461 = dma.done.wait [#allocation3], 256  }
  0x1d   :  { %462 = vsyncadd [#allocation3], 4294967040 }
  0x1e   :  { %36 = sfence }
  0x1f   :  { %s512_s4 = sld [smem:[#allocation2]]  ;;  %s514_s5 = sld [smem:[#allocation2 + $0x1]]  ;;  %v147_v0 = vlaneseq  ;;  %v532_v2 = vld [vmem:[#allocation6] sm:$0xff]  ;;  %vm190_vm0 = vcmask 1040384   ;;  %vm193_vm1 = vcmask 1041408   ;;  %vm196_vm2 = vcmask 1042432  }
  0x20   :  { %s516_s6 = sld [smem:[#allocation2 + $0x2]]  ;;  %s518_s7 = sld [smem:[#allocation2 + $0x3]]  ;;  %v207_v51 = vld [vmem:[#allocation6 + $0x8] sm:$0xff] }
  0x21   :  { %s520_s8 = sld [smem:[#allocation2 + $0x80]]  ;;  %s522_s1 = sld [smem:[#allocation2 + $0x81]]  ;;  %v148_v1 = vshrl.u32 %v147_v0, 7 }
  0x22   :  { %s524_s9 = sld [smem:[#allocation2 + $0x82]]  ;;  %s526_s10 = sld [smem:[#allocation2 + $0x83]] }
  0x23   :  { %s528_s11 = sld [smem:[#allocation2 + $0x100]]  ;;  %s530_s12 = sld [smem:[#allocation2 + $0x101]]  ;;  %v544_v5 = vsub.s32 0, %v148_v1  ;;  %v546_v6 = vsub.s32 4, %v148_v1 }
  0x24   :  { %s534_s13 = sld [smem:[#allocation2 + $0x102]]  ;;  %s536_s14 = sld [smem:[#allocation2 + $0x103]] }
  0x25   :  { %s538_s15 = sld [smem:[#allocation2 + $0x180]]  ;;  %s540_s16 = sld [smem:[#allocation2 + $0x181]]  ;;  %v54_v3 = vstv %s512_s4  ;;  %v56_v4 = vstv %s514_s5 }
  0x26   :  { %v55_v7 = vmul.f32 %v54_v3, %v532_v2  ;;  %v57_v8 = vmul.f32 %v56_v4, %v532_v2  ;;  %v63_v9 = vstv %s516_s6  ;;  %v70_v10 = vstv %s518_s7  ;;  %s556_s17 = sld [smem:[#allocation2 + $0x182]]  ;;  %s573_s18 = sld [smem:[#allocation2 + $0x183]] }
  0x27   :  { %v64_v11 = vmul.f32 %v63_v9, %v532_v2  ;;  %v71_v12 = vmul.f32 %v70_v10, %v532_v2  ;;  %v77_v13 = vstv %s520_s8  ;;  %v79_v14 = vstv %s522_s1  ;;  %s469_s19 = smov [#allocation7]  }
  0x28   :  { %v376_v15 = vrot.slane %v57_v8, 9  ;;  %v78_v16 = vmul.f32 %v77_v13, %v532_v2  ;;  %v80_v17 = vmul.f32 %v79_v14, %v532_v2  ;;  %v86_v18 = vstv %s524_s9  ;;  %s346_s20 = sshll.u32 %s469_s19, 4  ;;  %s347_s20 = int_to_ptr.vmem [resolvable:$true] %s346_s20 }
  0x29   :  { %v377_v19 = vrot.slane %v64_v11, 10  ;;  %v378_v20 = vrot.slane %v71_v12, 11  ;;  %v87_v21 = vmul.f32 %v86_v18, %v532_v2  ;;  %v93_v22 = vstv %s526_s10  ;;  %s437_s21 = scalar_lea.vmem %s347_s20, 256  ;;  %p442_p12 = scmp.lt.s32.totalorder %s347_s20, %s347_s20 }
  0x2a   :  { %v62_v23 = vadd.f32 %v376_v15, %v55_v7  ;;  %v379_v24 = vrot.slane %v80_v17, 9  ;;  %v94_v25 = vmul.f32 %v93_v22, %v532_v2  ;;  %v100_v26 = vstv %s528_s11  ;;  %p438_p11 = scmp.ne.s32.totalorder %s347_s20, %s437_s21  ;;  %p443_p13 = scmp.lt.s32.totalorder %s437_s21, %s437_s21 }
  0x2b   :  { %v380_v27 = vrot.slane %v87_v21, 10  ;;  %v101_v28 = vmul.f32 %v100_v26, %v532_v2  ;;  %v102_v29 = vstv %s530_s12  ;;  %v109_v30 = vstv %s534_s13 }
  0x2c   :  { %v69_v31 = vadd.f32 %v377_v19, %v62_v23  ;;  %v85_v32 = vadd.f32 %v379_v24, %v78_v16  ;;  %v381_v33 = vrot.slane %v94_v25, 11  ;;  %v103_v34 = vmul.f32 %v102_v29, %v532_v2  ;;  %p444_p0 = por %p443_p13, %p442_p12 }
  0x2d   :  { %v110_v35 = vmul.f32 %v109_v30, %v532_v2  ;;  %v116_v36 = vstv %s536_s14  ;;  %v123_v37 = vstv %s538_s15  ;;  %v125_v38 = vstv %s540_s16 }
  0x2e   :  { %v76_v39 = vadd.f32 %v378_v20, %v69_v31  ;;  %v92_v40 = vadd.f32 %v380_v27, %v85_v32  ;;  %v382_v41 = vrot.slane %v103_v34, 9  ;;  %v117_v42 = vmul.f32 %v116_v36, %v532_v2  ;;  %p445_p1 = pnand %p444_p0, %p438_p11 }
  0x2f   :  { %v383_v43 = vrot.slane %v110_v35, 10  ;;  %v124_v44 = vmul.f32 %v123_v37, %v532_v2  ;;  %v126_v45 = vmul.f32 %v125_v38, %v532_v2  ;;  %v132_v46 = vstv %s556_s17 }
  0x30   :  { %v99_v47 = vadd.f32 %v381_v33, %v92_v40  ;;  %v108_v48 = vadd.f32 %v382_v41, %v101_v28  ;;  %v384_v49 = vrot.slane %v117_v42, 11  ;;  %v133_v50 = vmul.f32 %v132_v46, %v532_v2 }
  0x31   :  { %v385_v52 = vrot.slane %v126_v45, 9  ;;  %v139_v53 = vstv %s573_s18  ;;  %v150_v54 = vrot.slane %v76_v39, %v544_v5  ;;  %v154_v55 = vrot.slane %v76_v39, %v546_v6 }
  0x32   :  { %v115_v56 = vadd.f32 %v383_v43, %v108_v48  ;;  %v386_v57 = vrot.slane %v133_v50, 10  ;;  %v140_v58 = vmul.f32 %v139_v53, %v532_v2  ;;  %v161_v59 = vrot.slane %v99_v47, %v544_v5 }
  0x33   :  { %v131_v60 = vadd.f32 %v385_v52, %v124_v44  ;;  %v165_v61 = vrot.slane %v99_v47, %v546_v6  ;;  %v208_v62 = vmul.f32 %v207_v51, %v54_v3  ;;  %v209_v63 = vmul.f32 %v207_v51, %v56_v4 }
  0x34   :  { %v122_v0 = vadd.f32 %v384_v49, %v115_v56  ;;  %v387_v1 = vrot.slane %v140_v58, 11  ;;  %v191_v7 = vsel %vm190_vm0, %v150_v54, %v161_v59  ;;  %v215_v8 = vmul.f32 %v207_v51, %v63_v9 }
  0x35   :  { %v138_v2 = vadd.f32 %v386_v57, %v131_v60  ;;  %v192_v11 = vsel %vm190_vm0, %v154_v55, %v165_v61  ;;  %v388_v12 = vrot.slane %v209_v63, 9  ;;  %v221_v15 = vmul.f32 %v207_v51, %v70_v10 }
  0x36   :  { %v172_v16 = vrot.slane %v122_v0, %v544_v5  ;;  %v176_v3 = vrot.slane %v122_v0, %v546_v6  ;;  %v389_v4 = vrot.slane %v215_v8, 10  ;;  %v227_v17 = vmul.f32 %v207_v51, %v77_v13 }
  0x37   :  { %v145_v19 = vadd.f32 %v387_v1, %v138_v2  ;;  %v214_v20 = vadd.f32 %v388_v12, %v208_v62  ;;  %v390_v21 = vrot.slane %v221_v15, 11  ;;  %v228_v9 = vmul.f32 %v207_v51, %v79_v14 }
  0x38   :  { %v194_v23 = vsel %vm193_vm1, %v191_v7, %v172_v16  ;;  %v195_v24 = vsel %vm193_vm1, %v192_v11, %v176_v3  ;;  %v234_v10 = vmul.f32 %v207_v51, %v86_v18  ;;  %v240_v25 = vmul.f32 %v207_v51, %v93_v22 }
  0x39   :  { %v183_v27 = vrot.slane %v145_v19, %v544_v5  ;;  %v187_v13 = vrot.slane %v145_v19, %v546_v6  ;;  %v220_v28 = vadd.f32 %v389_v4, %v214_v20  ;;  %v391_v31 = vrot.slane %v228_v9, 9 }
  0x3a   :  { %v392_v32 = vrot.slane %v234_v10, 10  ;;  %v393_v14 = vrot.slane %v240_v25, 11  ;;  %v246_v33 = vmul.f32 %v207_v51, %v100_v26  ;;  %v247_v34 = vmul.f32 %v207_v51, %v102_v29 }
  0x3b   :  { %v197_v18 = vsel %vm196_vm2, %v194_v23, %v183_v27  ;;  %v198_v35 = vsel %vm196_vm2, %v195_v24, %v187_v13  ;;  %v226_v22 = vadd.f32 %v390_v21, %v220_v28  ;;  %v233_v39 = vadd.f32 %v391_v31, %v227_v17 }
  0x3c   :  { %v201_v40 = vcombine.low %v197_v18, %v198_v35  ;;  %v394_v41 = vrot.slane %v247_v34, 9  ;;  %v253_v42 = vmul.f32 %v207_v51, %v109_v30  ;;  %v259_v43 = vmul.f32 %v207_v51, %v116_v36 }
  0x3d   :  { %v239_v44 = vadd.f32 %v392_v32, %v233_v39  ;;  %v265_v45 = vmul.f32 %v207_v51, %v123_v37  ;;  %v266_v47 = vmul.f32 %v207_v51, %v125_v38  ;;  %v272_v26 = vmul.f32 %v207_v51, %v132_v46 }
  0x3e   :  { %203 = vst [vmem:[#allocation7] sm:$0xff] %v201_v40  ;;  %v252_v29 = vadd.f32 %v394_v41, %v246_v33  ;;  %v395_v48 = vrot.slane %v253_v42, 10  ;;  %v396_v49 = vrot.slane %v259_v43, 11  ;;  %v278_v50 = vmul.f32 %v207_v51, %v139_v53 }
  0x3f   :  { %v245_v52 = vadd.f32 %v393_v14, %v239_v44  ;;  %v397_v54 = vrot.slane %v266_v47, 9  ;;  %v398_v55 = vrot.slane %v272_v26, 10  ;;  %v288_v56 = vrot.slane %v226_v22, %v544_v5 }
  0x40   :  { %v258_v57 = vadd.f32 %v395_v48, %v252_v29  ;;  %v292_v30 = vrot.slane %v226_v22, %v546_v6  ;;  %v399_v58 = vrot.slane %v278_v50, 11 }
  0x41   :  { %v271_v36 = vadd.f32 %v397_v54, %v265_v45  ;;  %v299_v37 = vrot.slane %v245_v52, %v544_v5  ;;  %v303_v38 = vrot.slane %v245_v52, %v546_v6 }
  0x42   :  { %v264_v46 = vadd.f32 %v396_v49, %v258_v57 }
  0x43   :  { %v277_v59 = vadd.f32 %v398_v55, %v271_v36  ;;  %v328_v60 = vsel %vm190_vm0, %v288_v56, %v299_v37  ;;  %v329_v51 = vsel %vm190_vm0, %v292_v30, %v303_v38 }
  0x44   :  { %v310_v53 = vrot.slane %v264_v46, %v544_v5  ;;  %v314_v61 = vrot.slane %v264_v46, %v546_v6 }
  0x45   :  { %v283_v62 = vadd.f32 %v399_v58, %v277_v59 }
  0x46   :  { %v330_v63 = vsel %vm193_vm1, %v328_v60, %v310_v53  ;;  %v331_v0 = vsel %vm193_vm1, %v329_v51, %v314_v61 }
  0x47   :  { %v321_v1 = vrot.slane %v283_v62, %v544_v5  ;;  %v325_v7 = vrot.slane %v283_v62, %v546_v6 }
  0x49   :  { %v332_v8 = vsel %vm196_vm2, %v330_v63, %v321_v1  ;;  %v333_v2 = vsel %vm196_vm2, %v331_v0, %v325_v7 }
  0x4a   :  { %v336_v11 = vcombine.low %v332_v8, %v333_v2 }
  0x4c   :  { %340 = vst [vmem:[#allocation7 + $0x8] sm:$0xff] %v336_v11 }
  0x4d   :  { %448 = shalt.err (!%p445_p1)
}
  0x4e   :  { %s449_s24 = scalar_lea.hbm %s683_s2, 256 }
  0x4f   :  { %p450_p2 = scmp.ne.s32.totalorder %s683_s2, %s449_s24  ;;  %p453_p3 = scmp.lt.u32.totalorder %s449_s24, %s683_s2 }
  0x51   :  { %p455_p4 = pnand %p453_p3, %p450_p2 }
  0x53   :  { %458 = shalt.err (!%p455_p4)
}
  0x54   :  { %352 = dma.vmem_to_hbm [thread:$0]  %s347_s20, 256, %s683_s2, [#allocation4], %s467_s0, %s467_s0, %s468_s29  }
  0x55   :  { %463 = dma.done.wait [#allocation4], 256  }
  0x56   :  { %464 = vsyncadd [#allocation4], 4294967040 }
  0x57   :  { %356 = vsyncpa [#allocation3], 1 }
  0x58   :  { %357 = vsyncpa [#allocation4], 1 }
  0x59   :  { %358 = vsyncpa [#allocation5], 1 }

</bundles_post_ra>
